<compile_context>
chip_gen: v6e
topology: v6e:2x2x1
jax: 0.10.0
libtpu: 0.0.40
codegen_flags: <defaults>
</compile_context>

<pallas_src>
import functools

import jax
import jax.numpy as jnp
from jax.experimental import pallas as pl
from jax.experimental.pallas import tpu as pltpu


def _dilate_kernel(x_ref, o_ref, *scratch, K, S, P, H, W):
    """x_ref: (BC, H, W) raw input tile; o_ref: (BC, Ho, Wo) blurred + clamped.

    scratch (present only when P > 0): xp_ref, a (BC, H+2P, W+2P) float32 VMEM
    buffer holding the zero-padded image, so no separate HBM padding pass exists.
    """
    if P > 0:
        xp_ref = scratch[0]
        xp_ref[...] = jnp.zeros_like(xp_ref)                 # zero border (tiny)
        xp_ref[:, P:P + H, P:P + W] = x_ref[...].astype(jnp.float32)
        xp = xp_ref[...]                                     # (BC, Hp, Wp) f32
    else:
        xp = x_ref[...].astype(jnp.float32)

    Hf = H + 2 * P - K + 1          # stride-1 output extents
    Wf = W + 2 * P - K + 1

    # Separable box filter: K lane-shifted adds then K sublane-shifted adds (VPU).
    tmp = xp[:, :, 0:Wf]
    for kj in range(1, K):
        tmp = tmp + xp[:, :, kj:kj + Wf]
    acc = tmp[:, 0:Hf, :]
    for ki in range(1, K):
        acc = acc + tmp[:, ki:ki + Hf, :]

    if S > 1:
        acc = acc[:, ::S, ::S]      # single strided subsample -> (BC, Ho, Wo)

    # Uniform kernel = mean over the KxK window, then clamp(max=1.0).
    out = jnp.minimum(acc * (1.0 / float(K * K)), 1.0)
    o_ref[...] = out.astype(o_ref.dtype)                     # one full-tile store


def dilate2d(x, kernelsize, stride=1, padding=0, block_c=None):
    """Pallas equivalent of Dilate2d.forward.

    x: (N, C, H, W) -> (N, C, Ho, Wo)
    """
    N, C, H, W = x.shape
    K, S, P = int(kernelsize), int(stride), int(padding)
    Hp, Wp = H + 2 * P, W + 2 * P
    Ho = (Hp - K) // S + 1
    Wo = (Wp - K) // S + 1
    NC = N * C

    xr = x.reshape(NC, H, W)        # contiguous -> free metadata reshape, no copy

    # Choose how many images to pack per grid step:
    #  - keep the per-step f32 padded working image around <= ~2 MiB (safe inside
    #    scoped VMEM with double-buffered input/output on v5e/v6e/v7x),
    #  - keep >= 2 grid steps when possible so both v7x TensorCores run,
    #  - prefer a block size that divides NC (avoids an HBM pad copy of x) unless
    #    that would shrink the block by more than 2x.
    if block_c is None:
        bytes_per_img = Hp * Wp * 4
        cap = max(1, min(NC, (2 << 20) // max(bytes_per_img, 1)))
        if NC >= 2:
            cap = min(cap, -(-NC // 2))                      # ceil(NC / 2)
        div = max(d for d in range(1, cap + 1) if NC % d == 0)
        block_c = div if 2 * div >= cap else cap
    block_c = max(1, min(int(block_c), NC))

    nc_pad = -(-NC // block_c) * block_c
    if nc_pad != NC:
        xr = jnp.pad(xr, ((0, nc_pad - NC), (0, 0), (0, 0)))

    scratch_shapes = []
    if P > 0:
        scratch_shapes.append(pltpu.VMEM((block_c, Hp, Wp), jnp.float32))

    kernel = functools.partial(_dilate_kernel, K=K, S=S, P=P, H=H, W=W)

    out = pl.pallas_call(
        kernel,
        out_shape=jax.ShapeDtypeStruct((nc_pad, Ho, Wo), x.dtype),
        grid=(nc_pad // block_c,),
        in_specs=[pl.BlockSpec((block_c, H, W), lambda i: (i, 0, 0))],
        out_specs=pl.BlockSpec((block_c, Ho, Wo), lambda i: (i, 0, 0)),
        scratch_shapes=tuple(scratch_shapes),
        compiler_params=pltpu.CompilerParams(
            dimension_semantics=("parallel",)),
    )(xr)

    return out[:NC].reshape(N, C, Ho, Wo)


def dilate2d_ref(x, kernelsize, stride=1, padding=0):
    """Pure-JAX reference mirroring the PyTorch module's forward."""
    C = x.shape[1]
    K = int(kernelsize)
    w = jnp.ones((C, 1, K, K), x.dtype) / float(K * K)
    y = jax.lax.conv_general_dilated(
        x, w,
        window_strides=(stride, stride),
        padding=[(padding, padding), (padding, padding)],
        dimension_numbers=("NCHW", "OIHW", "NCHW"),
        feature_group_count=C)
    return jnp.minimum(y, 1.0)


if __name__ == "__main__":
    key = jax.random.PRNGKey(0)
    # batch=2, channels=4, spatial=16 ; kernelsize=3, stride=1, padding=1
    x = jax.random.uniform(key, (2, 4, 16, 16), dtype=jnp.float32,
                           minval=0.0, maxval=2.0)  # some window means exceed 1 -> clamp exercised

    out = dilate2d(x, kernelsize=3, stride=1, padding=1)
    out = jax.block_until_ready(out)

    ref = dilate2d_ref(x, kernelsize=3, stride=1, padding=1)
    assert out.shape == ref.shape == (2, 4, 16, 16)
    assert jnp.allclose(out, ref, atol=1e-5, rtol=1e-5)
    print("KERNEL_OK")
</pallas_src>

<mosaic_0001>
module attributes {stable_mosaic.version = 11 : i64} {
  func.func @_dilate_kernel(%arg0: i32, %arg1: memref<4x16x16xf32, #tpu.memory_space<vmem>>, %arg2: memref<4x16x16xf32, #tpu.memory_space<vmem>>, %arg3: memref<4x18x18xf32, #tpu.memory_space<vmem>>) attributes {dimension_semantics = [#tpu.dimension_semantics<parallel>], iteration_bounds = array<i64: 2>, scalar_prefetch = 0 : i64, scratch_operands = 1 : i64, tpu.core_type = #tpu.core_type<tc>, window_params = [{transform_indices = @transform_0, window_bounds = array<i64: 4, 16, 16>}, {transform_indices = @transform_1, window_bounds = array<i64: 4, 16, 16>}]} {
    %cst = arith.constant 0.000000e+00 : f32
    %0 = vector.broadcast %cst : f32 to vector<4x18x18xf32>
    %c0 = arith.constant 0 : index
    %c0_0 = arith.constant 0 : index
    %c0_1 = arith.constant 0 : index
    %1 = vector.load %arg3[%c0, %c0_0, %c0_1] : memref<4x18x18xf32, #tpu.memory_space<vmem>>, vector<4x18x18xf32>
    tpu.vector_store %arg3[%c0, %c0_0, %c0_1], %0 {strides = array<i32>} : memref<4x18x18xf32, #tpu.memory_space<vmem>>, vector<4x18x18xf32>,
    %c0_2 = arith.constant 0 : index
    %c0_3 = arith.constant 0 : index
    %c0_4 = arith.constant 0 : index
    %2 = vector.load %arg1[%c0_2, %c0_3, %c0_4] : memref<4x16x16xf32, #tpu.memory_space<vmem>>, vector<4x16x16xf32>
    %c0_5 = arith.constant 0 : index
    %c1 = arith.constant 1 : index
    %c1_6 = arith.constant 1 : index
    %3 = vector.load %arg3[%c0_5, %c1, %c1_6] : memref<4x18x18xf32, #tpu.memory_space<vmem>>, vector<4x16x16xf32>
    tpu.vector_store %arg3[%c0_5, %c1, %c1_6], %2 {strides = array<i32>} : memref<4x18x18xf32, #tpu.memory_space<vmem>>, vector<4x16x16xf32>,
    %c0_7 = arith.constant 0 : index
    %c0_8 = arith.constant 0 : index
    %c0_9 = arith.constant 0 : index
    %4 = vector.load %arg3[%c0_7, %c0_8, %c0_9] : memref<4x18x18xf32, #tpu.memory_space<vmem>>, vector<4x18x18xf32>
    %5 = vector.extract_strided_slice %4 {offsets = [0, 0, 0], sizes = [4, 18, 16], strides = [1, 1, 1]} : vector<4x18x18xf32> to vector<4x18x16xf32>
    %6 = vector.extract_strided_slice %4 {offsets = [0, 0, 1], sizes = [4, 18, 16], strides = [1, 1, 1]} : vector<4x18x18xf32> to vector<4x18x16xf32>
    %7 = arith.addf %5, %6 : vector<4x18x16xf32>
    %8 = vector.extract_strided_slice %4 {offsets = [0, 0, 2], sizes = [4, 18, 16], strides = [1, 1, 1]} : vector<4x18x18xf32> to vector<4x18x16xf32>
    %9 = arith.addf %7, %8 : vector<4x18x16xf32>
    %10 = vector.extract_strided_slice %9 {offsets = [0, 0, 0], sizes = [4, 16, 16], strides = [1, 1, 1]} : vector<4x18x16xf32> to vector<4x16x16xf32>
    %11 = vector.extract_strided_slice %9 {offsets = [0, 1, 0], sizes = [4, 16, 16], strides = [1, 1, 1]} : vector<4x18x16xf32> to vector<4x16x16xf32>
    %12 = arith.addf %10, %11 : vector<4x16x16xf32>
    %13 = vector.extract_strided_slice %9 {offsets = [0, 2, 0], sizes = [4, 16, 16], strides = [1, 1, 1]} : vector<4x18x16xf32> to vector<4x16x16xf32>
    %14 = arith.addf %12, %13 : vector<4x16x16xf32>
    %cst_10 = arith.constant 0.111111112 : f32
    %15 = vector.broadcast %cst_10 : f32 to vector<4x16x16xf32>
    %16 = arith.mulf %14, %15 : vector<4x16x16xf32>
    %cst_11 = arith.constant 1.000000e+00 : f32
    %17 = vector.broadcast %cst_11 : f32 to vector<4x16x16xf32>
    %18 = arith.minimumf %16, %17 : vector<4x16x16xf32>
    %c0_12 = arith.constant 0 : index
    %c0_13 = arith.constant 0 : index
    %c0_14 = arith.constant 0 : index
    %19 = vector.load %arg2[%c0_12, %c0_13, %c0_14] : memref<4x16x16xf32, #tpu.memory_space<vmem>>, vector<4x16x16xf32>
    tpu.vector_store %arg2[%c0_12, %c0_13, %c0_14], %18 {strides = array<i32>} : memref<4x16x16xf32, #tpu.memory_space<vmem>>, vector<4x16x16xf32>,
    return
  }
  func.func @transform_0(%arg0: i32) -> (i32, i32, i32) {
    %c0_i32 = arith.constant 0 : i32
    %c0_i32_0 = arith.constant 0 : i32
    %c0_i32_1 = arith.constant 0 : i32
    return %arg0, %c0_i32, %c0_i32_0 : i32, i32, i32
  }
  func.func @transform_1(%arg0: i32) -> (i32, i32, i32) {
    %c0_i32 = arith.constant 0 : i32
    %c0_i32_0 = arith.constant 0 : i32
    %c0_i32_1 = arith.constant 0 : i32
    return %arg0, %c0_i32, %c0_i32_0 : i32, i32, i32
  }
}

</mosaic_0001>

<bundles_post_ra>
// kernel: tpu_custom_call.1
= control target key start
LH: loop header
LB: loop body
LE: loop exit
PB: predicated region body
PF: predicated region fallthrough
CT: control target
= control target key end

     0   :  { %6 = vsyncpa [#allocation4], 0  ;;  %s954_s0 = inlined_call_operand.hbm [shape: f32[8,16,16], index: 0, kind: input, shape index: {}]   ;;  %s955_s1 = inlined_call_operand.hbm [shape: f32[8,16,16], index: 1, kind: output, shape index: {}]  }
   0x1   :  { %8 = vsyncpa [#allocation4 + $0x1], 0 }
   0x2   :  { %9 = vsyncpa [#allocation5], 0 }
   0x3   :  { %11 = vsyncpa [#allocation5 + $0x1], 0  ;;  %s708_s6 = smov 0   ;;  %s710_s7 = smov 0  }
   0x4   :  { %s712_s8 = smov 0   ;;  %s714_s9 = smov 0  }
   0x5 LB: > { %s729_s10 = sadd.s32 4294967295, %s686_s9   ;;  %s520_s11 = sadd.s32 4294967294, %s686_s9   ;;  %s686_s9 = sphi %s714_s9, %s970_s9   ;;  %s682_s8 = sphi %s712_s8, %s969_s8   ;;  %s678_s7 = sphi %s710_s7, %s968_s7   ;;  %s674_s6 = sphi %s708_s6, %s967_s6  }
   0x6   : > { %s733_s12 = sadd.s32 1, %s686_s9   ;;  %s24_s13 = sadd.s32 1, %s682_s8 }
   0x7   : > { %s21_s14 = ssub.s32 %s686_s9, %s733_s12  ;;  %p31_p0 = scmp.ne.s32.totalorder %s682_s8, %s678_s7 }
   0x8   : > { %p22_p1 = scmp.eq.s32.totalorder %s21_s14, 0  ;;  %p32_p2 = scmp.eq.s32.totalorder %s686_s9, 0 }
   0x9   : > { %p37_p3 = scmp.ne.s32.totalorder %s678_s7, %s674_s6  ;;  %p38_p4 = scmp.eq.s32.totalorder %s729_s10, 0 }
   0xa   : > { %s745_s15 = scalar_select %p22_p1, %s682_s8, %s24_s13  }
   0xb   : > { %p747_p5 = por %p32_p2, %p31_p0  ;;  %p751_p6 = por %p38_p4, %p37_p3 }
   0xc   : > { %p61_p7 = scmp.eq.s32.totalorder %s729_s10, 1  ;;  %p67_p8 = scmp.eq.s32.totalorder %s520_s11, 1 }
   0xd   : > { %s959_s17 = scalar_select %p751_p6, 1, 0 }
   0xe   : > { %p552_p10 = scmp.lt.s32.totalorder %s686_s9, 2  ;;  %p758_p11 = por %p61_p7, %p31_p0 }
   0xf   : > { %p762_p12 = por %p67_p8, %p37_p3  ;;  %s87_s20 = sand.u32 1, %s682_s8  }
  0x10   : > { %s960_s18 = scalar_select %p758_p11, 1, 0 }
  0x11   : > { %s961_s19 = scalar_select %p762_p12, 1, 0 }
  0x12   : > { %s537_s21 = sshll.u32 %s686_s9, 10  ;;  %s523_s22 = sshll.u32 %s87_s20, 6 }
  0x13   : > { %s771_s25 = scalar_lea.hbm %s954_s0, %s537_s21  ;;  %s91_s26 = scalar_lea.vmem [#allocation3], %s523_s22 }
  0x14   : > { %s99_s27 = sshll.u32 %s91_s26, 4  ;;  %p775_p13 = pnand %p552_p10, %p747_p5  ;;  %s779_s27 = int_to_ptr.vmem [resolvable:$true] %s99_s27 }
  0x15   : > { %s781_s29 = scalar_lea.sflag [#allocation4], %s87_s20  ;;  %s594_s30 = scalar_lea.hbm %s771_s25, 1024 }
  0x16   : > { %p595_p0 = scmp.ne.s32.totalorder %s771_s25, %s594_s30  ;;  %p596_p1 = pneg %p775_p13 }
  0x17   : > { %s599_s4 = scalar_lea.hbm %s954_s0, 2048  ;;  %p600_p4 = scmp.lt.s32.totalorder %s771_s25, %s954_s0 }
  0x18   : > { %p597_p2 = pnand %p596_p1, %p595_p0  ;;  %p601_p5 = scmp.lt.s32.totalorder %s599_s4, %s594_s30 }
  0x1a   : > { %p598_p3 = pneg %p597_p2  ;;  %p602_p7 = por %p601_p5, %p600_p4 }
  0x1c   : > { %p603_p8 = pnand %p602_p7, %p598_p3 }
  0x1e   : > { %606 = shalt.err (!%p603_p8)
}
  0x1f   : > { %s607_s13 = scalar_lea.vmem %s779_s27, 1024  ;;  %s688_s14 = smov [#allocation3]  }
  0x20   : > { %p608_p10 = scmp.ne.s32.totalorder %s779_s27, %s607_s13  ;;  %s612_s16 = sshll.u32 %s688_s14, 4  ;;  %s613_s16 = int_to_ptr.vmem [resolvable:$false] %s612_s16 }
  0x21   : > { %s614_s20 = scalar_lea.vmem %s613_s16, 2048  ;;  %p615_p2 = scmp.lt.s32.totalorder %s779_s27, %s613_s16 }
  0x22   : > { %p610_p9 = pnand %p608_p10, %p596_p1  ;;  %p616_p12 = scmp.lt.s32.totalorder %s614_s20, %s607_s13 }
  0x24   : > { %p611_p0 = pneg %p610_p9  ;;  %p617_p11 = por %p616_p12, %p615_p2 }
  0x26   : > { %p618_p6 = pnand %p617_p11, %p611_p0 }
  0x28   : > { %621 = shalt.err (!%p618_p6)
}
  0x29   : > { %s689_s21 = smov 128   ;;  %s690_s22 = smov 8  }
  0x2a   : > { %547 = dma.hbm_to_vmem [thread:$0]  (!%p775_p13), %s771_s25, 1024, %s779_s27, %s781_s29, %s689_s21, %s689_s21, %s690_s22  }
  0x2b   : > { %p527_p9 = scmp.ge.s32.totalorder %s686_s9, 1  ;;  %p107_p1 = scmp.lt.s32.totalorder %s686_s9, 3 }
  0x2d   : > { %p108_p3 = pnand %p527_p9, %p107_p1 }
  0x2e   : > { %s805_s23 = sand.u32 (!%p108_p3), 1, %s678_s7   ;;  %p963_p6 = scmp.ne.s32.totalorder (!%p108_p3), %s959_s17, 0 }
  0x2f   : > { %111 = sbr.rel (%p108_p3) target bundleno = 368 (0x170), region = 24  ;;  %s528_s24 = sshll.u32 (!%p108_p3), %s805_s23, 6 }
  0x30   : > { %s114_s26 = scalar_lea.sflag (!%p108_p3), [#allocation4], %s805_s23  ;;  %s811_s30 = scalar_lea.vmem (!%p108_p3), [#allocation3], %s528_s24 }
  0x34   : > { %665 = dma.done.wait (%p963_p6), %s114_s26, 1024  }
  0x35   : > { %667 = vsyncadd (%p963_p6), %s114_s26, 4294966272  ;;  %vm138_vm0 = vcmask 146432   ;;  %vm141_vm1 = vcmask 140288   ;;  %v691_v0 = vmov 0.0   ;;  %v152_v1 = vld [vmem:[%s811_s30] sm:$0xff]  ;;  %v154_v2 = vld [vmem:[%s811_s30 + $0x10] sm:$0xff] }
  0x36   : > { %139 = vst.msk [vmem:[#allocation2] sm:$0xff] %vm138_vm0, %v691_v0  ;;  %140 = vst.msk [vmem:[#allocation2 + $0x8] sm:$0xff] %vm138_vm0, %v691_v0  ;;  %s692_s17 = smov 1   ;;  %v153_v3 = vld [vmem:[%s811_s30 + $0x8] sm:$0xff]  ;;  %v155_v4 = vld [vmem:[%s811_s30 + $0x18] sm:$0xff]  ;;  %vm192_vm2 = vcmask 138248  }
  0x37   : > { %143 = vst.msk [vmem:[#allocation2 + $0x18] sm:$0xff] %vm138_vm0, %v691_v0  ;;  %144 = vst.msk [vmem:[#allocation2 + $0x20] sm:$0xff] %vm138_vm0, %v691_v0  ;;  %168 = vrot.lane.b32.xlu0 %v152_v1, %s692_s17  ;;  %172 = vrot.lane.b32.xlu1 %v154_v2, %s692_s17  ;;  %v156_v5 = vld [vmem:[%s811_s30 + $0x20] sm:$0xff]  ;;  %v157_v6 = vld [vmem:[%s811_s30 + $0x28] sm:$0xff]  ;;  %s693_s25 = smov 127   ;;  %s694_s27 = smov 126  }
  0x38   : > { %146 = vst.msk [vmem:[#allocation2 + $0x30] sm:$0xff] %vm138_vm0, %v691_v0  ;;  %147 = vst.msk [vmem:[#allocation2 + $0x38] sm:$0xff] %vm138_vm0, %v691_v0  ;;  %v159_v7 = vld [vmem:[%s811_s30 + $0x38] sm:$0xff]  ;;  %v158_v8 = vld [vmem:[%s811_s30 + $0x30] sm:$0xff]  ;;  %vm333_vm3 = vcmask 1046528   ;;  %vm370_vm4 = vcmask 1045504  }
  0x39   : > { %149 = vst.msk [vmem:[#allocation2 + $0x48] sm:$0xff] %vm138_vm0, %v691_v0  ;;  %150 = vst.msk [vmem:[#allocation2 + $0x50] sm:$0xff] %vm138_vm0, %v691_v0  ;;  %vm423_vm5 = vcmask 130048   ;;  %s877_s28 = scalar_lea.vmem [#allocation6], %s528_s24  ;;  %s539_s29 = sshll.u32 %s729_s10, 10 }
  0x3a   : > { %142 = vst.msk [vmem:[#allocation2 + $0x10] sm:$0x3] %vm141_vm1, %v691_v0  ;;  %145 = vst.msk [vmem:[#allocation2 + $0x28] sm:$0x3] %vm141_vm1, %v691_v0  ;;  %s447_s2 = sshll.u32 %s877_s28, 4  ;;  %s907_s5 = scalar_lea.hbm %s955_s1, %s539_s29  ;;  %s909_s2 = int_to_ptr.vmem [resolvable:$true] %s447_s2 }
  0x3b   : > { %148 = vst.msk [vmem:[#allocation2 + $0x40] sm:$0x3] %vm141_vm1, %v691_v0  ;;  %151 = vst.msk [vmem:[#allocation2 + $0x58] sm:$0x3] %vm141_vm1, %v691_v0  ;;  %170 = vrot.lane.b32.xlu0 %v153_v3, %s692_s17  ;;  %174 = vrot.lane.b32.xlu1 %v155_v4, %s692_s17  ;;  %s433_s11 = scalar_lea.sflag [#allocation5], %s805_s23  ;;  %s622_s10 = scalar_lea.vmem %s909_s2, 1024 }
  0x3c   : > { %p623_p11 = scmp.ne.s32.totalorder %s909_s2, %s622_s10  ;;  %p964_p12 = scmp.ne.s32.totalorder %s960_s18, 0 }
  0x3d   : > { %s695_s13 = smov [#allocation6]  }
  0x3e   : > { %p624_p13 = pnand %p623_p11, %p964_p12  ;;  %s626_s14 = sshll.u32 %s695_s13, 4  ;;  %s627_s14 = int_to_ptr.vmem [resolvable:$false] %s626_s14 }
  0x3f   : > { %176 = vrot.lane.b32.xlu0 %v156_v5, %s692_s17  ;;  %178 = vrot.lane.b32.xlu1 %v157_v6, %s692_s17  ;;  %s628_s16 = scalar_lea.vmem %s627_s14, 2048  ;;  %p629_p5 = scmp.lt.s32.totalorder %s909_s2, %s627_s14 }
  0x40   : > { %p625_p4 = pneg %p624_p13  ;;  %p630_p7 = scmp.lt.s32.totalorder %s628_s16, %s622_s10 }
  0x42   : > { %p631_p8 = por %p630_p7, %p629_p5 }
  0x43   : > { %182 = vrot.lane.b32.xlu1 %v159_v7, %s692_s17  ;;  %180 = vrot.lane.b32.xlu0 %v158_v8, %s692_s17 }
  0x44   : > { %p632_p10 = pnand %p631_p8, %p625_p4 }
  0xa9   : > { %v169_v9 = vpop.permute.xlu0 %168  ;;  %v173_v10 = vpop.permute.xlu1 %172 }
  0xaa   : > { %193 = vst.msk [vmem:[#allocation2 + $0x1] sm:$0xff] %vm192_vm2, %v169_v9  ;;  %195 = vst.msk [vmem:[#allocation2 + $0x19] sm:$0xff] %vm192_vm2, %v173_v10 }
  0xad   : > { %v171_v11 = vpop.permute.xlu0 %170  ;;  %v175_v12 = vpop.permute.xlu1 %174 }
  0xae   : > { %194 = vst.msk [vmem:[#allocation2 + $0x9] sm:$0xff] %vm192_vm2, %v171_v11  ;;  %196 = vst.msk [vmem:[#allocation2 + $0x21] sm:$0xff] %vm192_vm2, %v175_v12 }
  0xb1   : > { %v201_v13 = vld [vmem:[#allocation2] sm:$0xff]  ;;  %v177_v14 = vpop.permute.xlu0 %176  ;;  %v179_v15 = vpop.permute.xlu1 %178  ;;  %v204_v20 = vld [vmem:[#allocation2 + $0x18] sm:$0xff] }
  0xb2   : > { %225 = vrot.lane.b32.xlu0 %v201_v13, %s693_s25  ;;  %197 = vst.msk [vmem:[#allocation2 + $0x31] sm:$0xff] %vm192_vm2, %v177_v14  ;;  %198 = vst.msk [vmem:[#allocation2 + $0x39] sm:$0xff] %vm192_vm2, %v179_v15 }
  0xb5   : > { %v202_v16 = vld [vmem:[#allocation2 + $0x8] sm:$0xff]  ;;  %v203_v17 = vld [vmem:[#allocation2 + $0x10] sm:$0x3]  ;;  %v183_v18 = vpop.permute.xlu1 %182  ;;  %v181_v19 = vpop.permute.xlu0 %180  ;;  %v205_v21 = vld [vmem:[#allocation2 + $0x20] sm:$0xff] }
  0xb6   : > { %227 = vrot.lane.b32.xlu1 %v202_v16, %s693_s25  ;;  %229 = vrot.lane.b32.xlu0 %v203_v17, %s693_s25  ;;  %200 = vst.msk [vmem:[#allocation2 + $0x51] sm:$0xff] %vm192_vm2, %v183_v18  ;;  %199 = vst.msk [vmem:[#allocation2 + $0x49] sm:$0xff] %vm192_vm2, %v181_v19  ;;  %v833_v22 = vld [vmem:[#allocation2 + $0x28] sm:$0x3] }
  0xb9   : > { %v835_v23 = vld [vmem:[#allocation2 + $0x30] sm:$0xff]  ;;  %v839_v24 = vld [vmem:[#allocation2 + $0x38] sm:$0xff]  ;;  %v841_v25 = vld [vmem:[#allocation2 + $0x40] sm:$0x3] }
  0xba   : > { %231 = vrot.lane.b32.xlu1 %v204_v20, %s693_s25  ;;  %233 = vrot.lane.b32.xlu0 %v205_v21, %s693_s25 }
  0xbd   : > { %v845_v26 = vld [vmem:[#allocation2 + $0x48] sm:$0xff]  ;;  %v847_v27 = vld [vmem:[#allocation2 + $0x50] sm:$0xff]  ;;  %v851_v28 = vld [vmem:[#allocation2 + $0x58] sm:$0x3] }
  0xbe   : > { %235 = vrot.lane.b32.xlu1 %v833_v22, %s693_s25  ;;  %237 = vrot.lane.b32.xlu0 %v835_v23, %s693_s25 }
  0xc2   : > { %239 = vrot.lane.b32.xlu1 %v839_v24, %s693_s25  ;;  %241 = vrot.lane.b32.xlu0 %v841_v25, %s693_s25 }
  0xc6   : > { %243 = vrot.lane.b32.xlu1 %v845_v26, %s693_s25  ;;  %245 = vrot.lane.b32.xlu0 %v847_v27, %s693_s25 }
  0xca   : > { %247 = vrot.lane.b32.xlu1 %v851_v28, %s693_s25  ;;  %273 = vrot.lane.b32.xlu0 %v201_v13, %s694_s27 }
  0xce   : > { %275 = vrot.lane.b32.xlu1 %v202_v16, %s694_s27  ;;  %277 = vrot.lane.b32.xlu0 %v203_v17, %s694_s27 }
  0xd2   : > { %279 = vrot.lane.b32.xlu1 %v204_v20, %s694_s27  ;;  %281 = vrot.lane.b32.xlu0 %v205_v21, %s694_s27 }
  0xd6   : > { %283 = vrot.lane.b32.xlu1 %v833_v22, %s694_s27  ;;  %285 = vrot.lane.b32.xlu0 %v835_v23, %s694_s27 }
  0xda   : > { %287 = vrot.lane.b32.xlu1 %v839_v24, %s694_s27  ;;  %289 = vrot.lane.b32.xlu0 %v841_v25, %s694_s27 }
  0xde   : > { %291 = vrot.lane.b32.xlu1 %v845_v26, %s694_s27  ;;  %293 = vrot.lane.b32.xlu0 %v847_v27, %s694_s27 }
  0xe2   : > { %295 = vrot.lane.b32.xlu1 %v851_v28, %s694_s27 }
 0x124   : > { %v226_v29 = vpop.permute.xlu0 %225 }
 0x125   : > { %v261_v40 = vadd.f32 %v226_v29, %v201_v13 }
 0x128   : > { %v228_v30 = vpop.permute.xlu1 %227  ;;  %v230_v31 = vpop.permute.xlu0 %229 }
 0x129   : > { %v262_v44 = vadd.f32 %v228_v30, %v202_v16  ;;  %v263_v45 = vadd.f32 %v230_v31, %v203_v17 }
 0x12c   : > { %v232_v32 = vpop.permute.xlu1 %231  ;;  %v234_v33 = vpop.permute.xlu0 %233 }
 0x12d   : > { %v264_v55 = vadd.f32 %v232_v32, %v204_v20  ;;  %v265_v56 = vadd.f32 %v234_v33, %v205_v21 }
 0x130   : > { %v236_v34 = vpop.permute.xlu1 %235  ;;  %v238_v35 = vpop.permute.xlu0 %237 }
 0x131   : > { %v266_v2 = vadd.f32 %v236_v34, %v833_v22  ;;  %v267_v3 = vadd.f32 %v238_v35, %v835_v23 }
 0x134   : > { %v240_v36 = vpop.permute.xlu1 %239  ;;  %v242_v37 = vpop.permute.xlu0 %241 }
 0x135   : > { %v268_v6 = vadd.f32 %v240_v36, %v839_v24  ;;  %v269_v16 = vadd.f32 %v242_v37, %v841_v25 }
 0x138   : > { %v244_v38 = vpop.permute.xlu1 %243  ;;  %v246_v39 = vpop.permute.xlu0 %245 }
 0x139   : > { %v270_v20 = vadd.f32 %v244_v38, %v845_v26  ;;  %v271_v24 = vadd.f32 %v246_v39, %v847_v27 }
 0x13c   : > { %v248_v41 = vpop.permute.xlu1 %247  ;;  %v274_v42 = vpop.permute.xlu0 %273 }
 0x13d   : > { %v309_v43 = vadd.f32 %v274_v42, %v261_v40  ;;  %v272_v34 = vadd.f32 %v248_v41, %v851_v28 }
 0x13f   : > { %v334_v50 = vrot.slane %v309_v43, 1  ;;  %v371_v59 = vrot.slane %v309_v43, 2 }
 0x140   : > { %v276_v46 = vpop.permute.xlu1 %275  ;;  %v278_v47 = vpop.permute.xlu0 %277 }
 0x141   : > { %v310_v48 = vadd.f32 %v276_v46, %v262_v44  ;;  %v311_v49 = vadd.f32 %v278_v47, %v263_v45 }
 0x143   : > { %v335_v51 = vrot.slane %v310_v48, 1  ;;  %v372_v52 = vrot.slane %v310_v48, 2  ;;  %v337_v53 = vrot.slane %v311_v49, 1  ;;  %v374_v54 = vrot.slane %v311_v49, 2 }
 0x144   : > { %v280_v57 = vpop.permute.xlu1 %279  ;;  %v282_v58 = vpop.permute.xlu0 %281 }
 0x145   : > { %v336_v60 = vsel %vm333_vm3, %v334_v50, %v335_v51  ;;  %v338_v61 = vsel %vm333_vm3, %v335_v51, %v337_v53  ;;  %v312_v0 = vadd.f32 %v280_v57, %v264_v55  ;;  %v313_v1 = vadd.f32 %v282_v58, %v265_v56 }
 0x146   : > { %v362_v62 = vadd.f32 %v336_v60, %v309_v43  ;;  %v363_v63 = vadd.f32 %v338_v61, %v310_v48  ;;  %v373_v4 = vsel %vm370_vm4, %v371_v59, %v372_v52  ;;  %v375_v5 = vsel %vm370_vm4, %v372_v52, %v374_v54 }
 0x147   : > { %v339_v9 = vrot.slane %v312_v0, 1  ;;  %v376_v12 = vrot.slane %v312_v0, 2  ;;  %v340_v13 = vrot.slane %v313_v1, 1  ;;  %v377_v14 = vrot.slane %v313_v1, 2 }
 0x148   : > { %v399_v7 = vadd.f32 %v373_v4, %v362_v62  ;;  %v400_v8 = vadd.f32 %v375_v5, %v363_v63  ;;  %v284_v10 = vpop.permute.xlu1 %283  ;;  %v286_v11 = vpop.permute.xlu0 %285 }
 0x149   : > { %v314_v15 = vadd.f32 %v284_v10, %v266_v2  ;;  %v315_v19 = vadd.f32 %v286_v11, %v267_v3  ;;  %v341_v21 = vsel %vm333_vm3, %v339_v9, %v340_v13  ;;  %v378_v25 = vsel %vm370_vm4, %v376_v12, %v377_v14 }
 0x14a   : > { %v407_v17 = vmul.f32 0.11111111, %v399_v7  ;;  %v408_v18 = vmul.f32 0.11111111, %v400_v8  ;;  %v364_v31 = vadd.f32 %v341_v21, %v312_v0 }
 0x14b   : > { %v342_v22 = vrot.slane %v314_v15, 1  ;;  %v379_v23 = vrot.slane %v314_v15, 2  ;;  %v344_v37 = vrot.slane %v315_v19, 1  ;;  %v381_v39 = vrot.slane %v315_v19, 2 }
 0x14c   : > { %v415_v29 = vmin.f32 %v407_v17, 1.0  ;;  %v416_v30 = vmin.f32 %v408_v18, 1.0  ;;  %v288_v32 = vpop.permute.xlu1 %287  ;;  %v290_v33 = vpop.permute.xlu0 %289  ;;  %v401_v26 = vadd.f32 %v378_v25, %v364_v31 }
 0x14d   : > { %v343_v35 = vsel %vm333_vm3, %v340_v13, %v342_v22  ;;  %v316_v36 = vadd.f32 %v288_v32, %v268_v6  ;;  %v317_v38 = vadd.f32 %v290_v33, %v269_v16  ;;  %v380_v28 = vsel %vm370_vm4, %v377_v14, %v379_v23 }
 0x14e   : > { %424 = vst.msk [vmem:[%s877_s28] sm:$0xff] %vm423_vm5, %v415_v29  ;;  %425 = vst.msk [vmem:[%s877_s28 + $0x8] sm:$0xff] %vm423_vm5, %v416_v30  ;;  %v365_v27 = vadd.f32 %v343_v35, %v313_v1  ;;  %v409_v42 = vmul.f32 0.11111111, %v401_v26 }
 0x14f   : > { %v345_v40 = vrot.slane %v316_v36, 1  ;;  %v382_v41 = vrot.slane %v316_v36, 2  ;;  %v347_v44 = vrot.slane %v317_v38, 1  ;;  %v384_v45 = vrot.slane %v317_v38, 2 }
 0x150   : > { %v402_v43 = vadd.f32 %v380_v28, %v365_v27  ;;  %v292_v46 = vpop.permute.xlu1 %291  ;;  %v294_v47 = vpop.permute.xlu0 %293  ;;  %v417_v52 = vmin.f32 %v409_v42, 1.0 }
 0x151   : > { %v346_v48 = vsel %vm333_vm3, %v344_v37, %v345_v40  ;;  %v383_v49 = vsel %vm370_vm4, %v381_v39, %v382_v41  ;;  %v318_v50 = vadd.f32 %v292_v46, %v270_v20  ;;  %v319_v51 = vadd.f32 %v294_v47, %v271_v24 }
 0x152   : > { %v410_v53 = vmul.f32 0.11111111, %v402_v43  ;;  %v366_v54 = vadd.f32 %v346_v48, %v315_v19  ;;  %v348_v55 = vsel %vm333_vm3, %v345_v40, %v347_v44  ;;  %v385_v57 = vsel %vm370_vm4, %v382_v41, %v384_v45  ;;  %426 = vst.msk [vmem:[%s877_s28 + $0x10] sm:$0xff] %vm423_vm5, %v417_v52 }
 0x153   : > { %v367_v56 = vadd.f32 %v348_v55, %v316_v36  ;;  %v349_v58 = vrot.slane %v318_v50, 1  ;;  %v386_v59 = vrot.slane %v318_v50, 2  ;;  %v350_v62 = vrot.slane %v319_v51, 1 }
 0x154   : > { %v418_v60 = vmin.f32 %v410_v53, 1.0  ;;  %v403_v61 = vadd.f32 %v383_v49, %v366_v54  ;;  %v387_v63 = vrot.slane %v319_v51, 2  ;;  %v296_v0 = vpop.permute.xlu1 %295 }
 0x155   : > { %v404_v1 = vadd.f32 %v385_v57, %v367_v56  ;;  %v320_v2 = vadd.f32 %v296_v0, %v272_v34  ;;  %v351_v4 = vsel %vm333_vm3, %v349_v58, %v350_v62 }
 0x156   : > { %427 = vst.msk [vmem:[%s877_s28 + $0x18] sm:$0xff] %vm423_vm5, %v418_v60  ;;  %v411_v3 = vmul.f32 0.11111111, %v403_v61  ;;  %v368_v6 = vadd.f32 %v351_v4, %v318_v50  ;;  %v388_v10 = vsel %vm370_vm4, %v386_v59, %v387_v63 }
 0x157   : > { %v412_v5 = vmul.f32 0.11111111, %v404_v1  ;;  %v352_v7 = vrot.slane %v320_v2, 1  ;;  %v389_v8 = vrot.slane %v320_v2, 2 }
 0x158   : > { %v419_v9 = vmin.f32 %v411_v3, 1.0  ;;  %v405_v12 = vadd.f32 %v388_v10, %v368_v6 }
 0x159   : > { %v420_v11 = vmin.f32 %v412_v5, 1.0  ;;  %v353_v13 = vsel %vm333_vm3, %v350_v62, %v352_v7  ;;  %v390_v16 = vsel %vm370_vm4, %v387_v63, %v389_v8 }
 0x15a   : > { %428 = vst.msk [vmem:[%s877_s28 + $0x20] sm:$0xff] %vm423_vm5, %v419_v9  ;;  %v369_v14 = vadd.f32 %v353_v13, %v319_v51  ;;  %v413_v15 = vmul.f32 0.11111111, %v405_v12 }
 0x15b   : > { %429 = vst.msk [vmem:[%s877_s28 + $0x28] sm:$0xff] %vm423_vm5, %v420_v11 }
 0x15c   : > { %v406_v17 = vadd.f32 %v390_v16, %v369_v14  ;;  %v421_v18 = vmin.f32 %v413_v15, 1.0 }
 0x15e   : > { %v414_v19 = vmul.f32 0.11111111, %v406_v17  ;;  %430 = vst.msk [vmem:[%s877_s28 + $0x30] sm:$0xff] %vm423_vm5, %v421_v18 }
 0x160   : > { %v422_v20 = vmin.f32 %v414_v19, 1.0 }
 0x162   : > { %431 = vst.msk [vmem:[%s877_s28 + $0x38] sm:$0xff] %vm423_vm5, %v422_v20 }
 0x163   : > { %635 = shalt.err (!%p632_p10)
}
 0x164   : > { %s636_s20 = scalar_lea.hbm %s907_s5, 1024  ;;  %s640_s24 = scalar_lea.hbm %s955_s1, 2048 }
 0x165   : > { %p637_p0 = scmp.ne.s32.totalorder %s907_s5, %s636_s20  ;;  %p641_p1 = scmp.lt.s32.totalorder %s907_s5, %s955_s1 }
 0x166   : > { %p642_p3 = scmp.lt.s32.totalorder %s640_s24, %s636_s20 }
 0x167   : > { %p638_p2 = pnand %p637_p0, %p964_p12 }
 0x168   : > { %p643_p6 = por %p642_p3, %p641_p1 }
 0x169   : > { %p639_p9 = pneg %p638_p2 }
 0x16b   : > { %p644_p11 = pnand %p643_p6, %p639_p9 }
 0x16d   : > { %647 = shalt.err (!%p644_p11)
}
 0x16e   : > { %s696_s17 = smov 128   ;;  %s697_s25 = smov 8  }
 0x16f   : > { %542 = dma.vmem_to_hbm [thread:$0]  (%p964_p12), %s909_s2, 1024, %s907_s5, %s433_s11, %s696_s17, %s696_s17, %s697_s25  }
 0x170 PF: > { %s462_s27 = sand.u32 1, %s674_s6   ;;  %p965_p13 = scmp.ne.s32.totalorder %s961_s19, 0 }
 0x171   : > { %p966_p4 = scmp.ge.s32.totalorder %s686_s9, 2  ;;  %s463_s28 = scalar_lea.sflag [#allocation5], %s462_s27 }
 0x173   : > { %p549_p5 = pnand %p966_p4, %p965_p13 }
 0x175   : > { %p550_p7 = pneg %p549_p5 }
 0x177   : > { %669 = dma.done.wait (%p550_p7), %s463_s28, 1024  }
 0x178   : > { %671 = vsyncadd (%p550_p7), %s463_s28, 4294966272  ;;  %p14_p8 = scmp.ge.s32.totalorder %s733_s12, 4   ;;  %s967_s6 = smov %s678_s7 }
 0x179   : > { %s968_s7 = smov %s682_s8  ;;  %s969_s8 = smov %s745_s15 }
 0x17a   : > { %s970_s9 = smov %s733_s12  ;;  %16 = sbr.rel (!%p14_p8) target bundleno = 5 (0x5), region = 69 }
 0x17f   :  { %468 = vsyncpa [#allocation4], 1 }
 0x180   :  { %470 = vsyncpa [#allocation4 + $0x1], 1 }
 0x181   :  { %471 = vsyncpa [#allocation5], 1 }
 0x182   :  { %473 = vsyncpa [#allocation5 + $0x1], 1 }

</bundles_post_ra>
